<compile_context>
chip_gen: v7x
topology: tpu7x:2x2x1
jax: 0.10.0
libtpu: 0.0.40
codegen_flags: <defaults>
</compile_context>

<pallas_src>
import functools
import math

import jax
import jax.numpy as jnp
from jax.experimental import pallas as pl
from jax.experimental.pallas import tpu as pltpu


def _round_up(x, m):
    return (x + m - 1) // m * m


def _vmem_capacity_bytes():
    """Per-TensorCore VMEM capacity; conservative v7x floor if unknown."""
    try:
        cap = getattr(pltpu.get_tpu_info(), "vmem_capacity_bytes", None)
        if cap:
            return int(cap)
    except Exception:
        pass
    return 64 << 20


# -----------------------------------------------------------------------------
# Strategy 1: VMEM-resident table, exact per-row copy gather.
# -----------------------------------------------------------------------------
def _resident_kernel(labels_ref, table_ref, out_ref, *, tb):
    # labels_ref: (B_pad,) int32 in SMEM (scalar prefetch, CFG drop pre-applied)
    # table_ref : (V, H) VMEM-resident, single buffered (invariant block)
    # out_ref   : (TB, H) output block
    base = pl.program_id(0) * tb

    @pl.loop(0, tb)
    def _(r):
        lbl = labels_ref[base + r]
        out_ref[pl.ds(r, 1), :] = table_ref[pl.ds(lbl, 1), :]


# -----------------------------------------------------------------------------
# Strategy 2: table in HBM, pipelined per-row DMA gather directly into out block.
# -----------------------------------------------------------------------------
def _hbm_gather_kernel(labels_ref, table_hbm, out_ref, copy_sems, *, tb, nbuf):
    base = pl.program_id(0) * tb

    def issue(r):
        lbl = labels_ref[base + r]
        pltpu.make_async_copy(
            table_hbm.at[pl.ds(lbl, 1), :],
            out_ref.at[pl.ds(r, 1), :],
            copy_sems.at[r % nbuf],
        ).start()

    def wait_slot(slot):
        # Shape-only descriptor (same (1, H) transfer size) to wait on `slot`.
        pltpu.make_async_copy(
            table_hbm.at[pl.ds(0, 1), :],
            out_ref.at[pl.ds(0, 1), :],
            copy_sems.at[slot],
        ).wait()

    nprime = min(nbuf, tb)

    @pl.loop(0, nprime)            # prime: put nprime row copies in flight
    def _(r):
        issue(r)

    @pl.loop(nprime, tb)           # steady state: free a slot, reuse it
    def _(r):
        slot = r % nbuf
        wait_slot(slot)
        issue(r)

    @pl.loop(tb - nprime, tb)      # drain the tail copies before the block ends
    def _(r):
        wait_slot(r % nbuf)


# -----------------------------------------------------------------------------
# Wrapper: replicates LabelEmbedder.forward(labels, train, force_drop_ids).
# -----------------------------------------------------------------------------
@functools.partial(
    jax.jit, static_argnames=("num_classes", "dropout_prob", "train", "strategy")
)
def label_embedder_forward(
    labels,
    embedding_table,
    *,
    num_classes,
    dropout_prob,
    train,
    drop_key=None,
    force_drop_ids=None,
    strategy="auto",
):
    labels = labels.astype(jnp.int32)
    (B,) = labels.shape
    V, H = embedding_table.shape            # V = num_classes + use_cfg_embedding
    dtype = embedding_table.dtype
    itemsize = jnp.dtype(dtype).itemsize

    # --- classifier-free-guidance token drop (folded into labels once) -------
    use_dropout = dropout_prob > 0
    apply_drop = (train and use_dropout) or (force_drop_ids is not None)
    if apply_drop:
        if force_drop_ids is None:
            if drop_key is None:
                raise ValueError("drop_key required when train=True and dropout_prob>0")
            drop = jax.random.uniform(drop_key, (B,)) < dropout_prob
        else:
            drop = force_drop_ids == 1
        labels = jnp.where(drop, jnp.int32(num_classes), labels)

    # --- balanced batch tiles (<= sub-1 rows of padding per tile) ------------
    sub = {4: 8, 2: 16, 1: 32}.get(itemsize, 8)
    max_tb = 256
    num_tiles = max(1, -(-B // max_tb))
    TB = _round_up(-(-B // num_tiles), sub)
    B_pad = TB * num_tiles
    labels_pad = jnp.pad(labels, (0, B_pad - B))        # padded rows read row 0

    # --- strategy selection with generation-aware VMEM budget ----------------
    vmem_cap = _vmem_capacity_bytes()
    vmem_ceiling = int(0.8 * vmem_cap)                  # headroom for Mosaic scratch
    table_bytes = V * H * itemsize                      # single-buffered table
    out_bytes = 2 * TB * H * itemsize                   # double-buffered out block
    resident_need = table_bytes + out_bytes + (2 << 20)
    fits = resident_need <= vmem_ceiling
    if strategy == "auto":
        use_resident = fits and B_pad >= V              # amortize the table fetch
    elif strategy == "resident":
        use_resident = True
    elif strategy == "hbm_gather":
        use_resident = False
    else:
        raise ValueError(f"unknown strategy: {strategy}")

    out_shape = jax.ShapeDtypeStruct((B_pad, H), dtype)
    out_spec = pl.BlockSpec((TB, H), lambda i, lbl: (i, 0))

    # Megacore: only shard the batch axis when it does not duplicate the
    # dominant table transfer (resident path fetches a table copy per core).
    if num_tiles <= 1 or (use_resident and B_pad * H < 2 * V * H):
        dims = ("arbitrary",)
    else:
        dims = ("parallel",)

    if use_resident:
        vmem_needed = resident_need
        bytes_accessed = table_bytes + B_pad * H * itemsize + 4 * B_pad
        table_spec = pl.BlockSpec(
            (V, H),
            lambda i, lbl: (0, 0),
            pipeline_mode=pl.Buffered(buffer_count=1),  # invariant block: 1 buffer
        )
        kernel = functools.partial(_resident_kernel, tb=TB)
        scratch = []
    else:
        nbuf = min(8, TB)                               # row DMAs in flight
        vmem_needed = out_bytes + (2 << 20)
        bytes_accessed = 2 * B_pad * H * itemsize + 4 * B_pad
        table_spec = pl.BlockSpec(memory_space=pl.ANY)  # table stays in HBM
        kernel = functools.partial(_hbm_gather_kernel, tb=TB, nbuf=nbuf)
        scratch = [pltpu.SemaphoreType.DMA((nbuf,))]

    compiler_params = pltpu.CompilerParams(
        dimension_semantics=dims,
        vmem_limit_bytes=int(min(max(vmem_needed, 32 << 20), vmem_ceiling)),
    )
    cost = pl.CostEstimate(
        flops=int(B_pad * H), transcendentals=0, bytes_accessed=int(bytes_accessed)
    )

    grid_spec = pltpu.PrefetchScalarGridSpec(
        num_scalar_prefetch=1,                          # labels -> SMEM
        grid=(num_tiles,),
        in_specs=[table_spec],
        out_specs=out_spec,
        scratch_shapes=scratch,
    )
    out = pl.pallas_call(
        kernel,
        grid_spec=grid_spec,
        out_shape=out_shape,
        compiler_params=compiler_params,
        cost_estimate=cost,
    )(labels_pad, embedding_table)

    return out[:B]


if __name__ == "__main__":
    num_classes = 10
    hidden_size = 128
    dropout_prob = 0.1
    batch = 8

    use_cfg_embedding = int(dropout_prob > 0)

    root = jax.random.PRNGKey(0)
    k_table, k_labels, k_drop = jax.random.split(root, 3)

    # nn.Embedding default init ~ N(0, 1); deterministic synthetic weights.
    embedding_table = jax.random.normal(
        k_table, (num_classes + use_cfg_embedding, hidden_size), dtype=jnp.float32
    )
    labels = jax.random.randint(k_labels, (batch,), 0, num_classes, dtype=jnp.int32)

    common = dict(num_classes=num_classes, dropout_prob=dropout_prob)

    # Eval mode (auto strategy: B < V -> HBM DMA row-gather path).
    emb_eval = label_embedder_forward(labels, embedding_table, train=False, **common)
    emb_eval = jax.block_until_ready(emb_eval)
    ref_eval = embedding_table[labels]
    assert emb_eval.shape == (batch, hidden_size)
    assert jnp.allclose(emb_eval, ref_eval), "eval-mode (hbm_gather) mismatch"

    # Explicitly exercise the VMEM-resident row-copy path as well.
    emb_res = label_embedder_forward(
        labels, embedding_table, train=False, strategy="resident", **common
    )
    emb_res = jax.block_until_ready(emb_res)
    assert jnp.allclose(emb_res, ref_eval), "resident-table path mismatch"

    # Train mode with classifier-free-guidance token drop (same key as reference).
    emb_train = label_embedder_forward(
        labels, embedding_table, train=True, drop_key=k_drop, **common
    )
    emb_train = jax.block_until_ready(emb_train)
    drop_ids_ref = jax.random.uniform(k_drop, (batch,)) < dropout_prob
    labels_ref = jnp.where(drop_ids_ref, jnp.int32(num_classes), labels)
    ref_train = embedding_table[labels_ref]
    assert jnp.allclose(emb_train, ref_train), "train-mode embedding mismatch"

    # force_drop_ids path: every label replaced by the CFG (num_classes) row.
    force_drop = jnp.ones((batch,), dtype=jnp.int32)
    emb_forced = label_embedder_forward(
        labels, embedding_table, train=False, force_drop_ids=force_drop, **common
    )
    emb_forced = jax.block_until_ready(emb_forced)
    ref_forced = jnp.broadcast_to(embedding_table[num_classes], (batch, hidden_size))
    assert jnp.allclose(emb_forced, ref_forced), "forced-drop embedding mismatch"

    print("KERNEL_OK")
</pallas_src>

<mosaic_0001>
module attributes {stable_mosaic.version = 11 : i64} {
  func.func @_hbm_gather_kernel(%arg0: i32, %arg1: memref<8xi32, #tpu.memory_space<smem>>, %arg2: memref<11x128xf32, #tpu.memory_space<any>>, %arg3: memref<8x128xf32, #tpu.memory_space<vmem>>, %arg4: memref<8x!tpu.dma_semaphore, #tpu.memory_space<semaphore_mem>>) attributes {dimension_semantics = [#tpu.dimension_semantics<arbitrary>], iteration_bounds = array<i64: 1>, scalar_prefetch = 1 : i64, scratch_operands = 1 : i64, tpu.core_type = #tpu.core_type<tc>, window_params = [{}, {transform_indices = @transform_1, window_bounds = array<i64: 8, 128>}]} {
    %c8_i32 = arith.constant 8 : i32
    %0 = arith.muli %arg0, %c8_i32 : i32
    %c0_i32 = arith.constant 0 : i32
    %c8_i32_0 = arith.constant 8 : i32
    %1 = arith.addi %c0_i32, %c8_i32_0 : i32
    %c1_i32 = arith.constant 1 : i32
    scf.for %arg5 = %c0_i32 to %1 step %c1_i32  : i32 {
      %c1_i32_10 = arith.constant 1 : i32
      %4 = arith.muli %arg5, %c1_i32_10 : i32
      %c0_i32_11 = arith.constant 0 : i32
      %5 = arith.addi %c0_i32_11, %4 : i32
      %6 = arith.addi %0, %5 : i32
      %7 = arith.index_cast %6 : i32 to index
      %8 = memref.load %arg1[%7] : memref<8xi32, #tpu.memory_space<smem>>
      %c8_i32_12 = arith.constant 8 : i32
      %c0_i32_13 = arith.constant 0 : i32
      %9 = arith.cmpi eq, %c8_i32_12, %c0_i32_13 : i32
      %c1_i32_14 = arith.constant 1 : i32
      %10 = arith.select %9, %c1_i32_14, %c8_i32_12 : i32
      %11 = arith.remsi %5, %10 : i32
      %c0_i32_15 = arith.constant 0 : i32
      %12 = arith.cmpi ne, %11, %c0_i32_15 : i32
      %c0_i32_16 = arith.constant 0 : i32
      %13 = arith.cmpi slt, %11, %c0_i32_16 : i32
      %c0_i32_17 = arith.constant 0 : i32
      %14 = arith.cmpi slt, %10, %c0_i32_17 : i32
      %15 = arith.xori %13, %14 : i1
      %16 = arith.andi %15, %12 : i1
      %17 = arith.addi %11, %10 : i32
      %18 = arith.select %16, %17, %11 : i32
      %c0_i32_18 = arith.constant 0 : i32
      %19 = tpu.memref_slice %arg2[%8, %c0_i32_18] : memref<11x128xf32, #tpu.memory_space<any>> -> memref<1x128xf32, #tpu.memory_space<any>>
      %c0_i32_19 = arith.constant 0 : i32
      %20 = tpu.memref_slice %arg3[%5, %c0_i32_19] : memref<8x128xf32, #tpu.memory_space<vmem>> -> memref<1x128xf32, #tpu.memory_space<vmem>>
      %21 = tpu.memref_slice %arg4[%18] : memref<8x!tpu.dma_semaphore, #tpu.memory_space<semaphore_mem>> -> memref<1x!tpu.dma_semaphore, #tpu.memory_space<semaphore_mem>>
      %22 = tpu.memref_squeeze %21 : memref<1x!tpu.dma_semaphore, #tpu.memory_space<semaphore_mem>> -> memref<!tpu.dma_semaphore, #tpu.memory_space<semaphore_mem>>
      tpu.enqueue_dma source(%19 : memref<1x128xf32, #tpu.memory_space<any>>) target(%20 : memref<1x128xf32, #tpu.memory_space<vmem>>) target_semaphore(%22 : memref<!tpu.dma_semaphore, #tpu.memory_space<semaphore_mem>>)
    }
    %c8_i32_1 = arith.constant 8 : i32
    %c0_i32_2 = arith.constant 0 : i32
    %c0_i32_3 = arith.constant 0 : i32
    %2 = arith.addi %c0_i32_2, %c0_i32_3 : i32
    %c1_i32_4 = arith.constant 1 : i32
    scf.for %arg5 = %c0_i32_2 to %2 step %c1_i32_4  : i32 {
      %c1_i32_10 = arith.constant 1 : i32
      %4 = arith.muli %arg5, %c1_i32_10 : i32
      %c8_i32_11 = arith.constant 8 : i32
      %5 = arith.addi %c8_i32_11, %4 : i32
      %c8_i32_12 = arith.constant 8 : i32
      %c0_i32_13 = arith.constant 0 : i32
      %6 = arith.cmpi eq, %c8_i32_12, %c0_i32_13 : i32
      %c1_i32_14 = arith.constant 1 : i32
      %7 = arith.select %6, %c1_i32_14, %c8_i32_12 : i32
      %8 = arith.remsi %5, %7 : i32
      %c0_i32_15 = arith.constant 0 : i32
      %9 = arith.cmpi ne, %8, %c0_i32_15 : i32
      %c0_i32_16 = arith.constant 0 : i32
      %10 = arith.cmpi slt, %8, %c0_i32_16 : i32
      %c0_i32_17 = arith.constant 0 : i32
      %11 = arith.cmpi slt, %7, %c0_i32_17 : i32
      %12 = arith.xori %10, %11 : i1
      %13 = arith.andi %12, %9 : i1
      %14 = arith.addi %8, %7 : i32
      %15 = arith.select %13, %14, %8 : i32
      %c0_i32_18 = arith.constant 0 : i32
      %c0_i32_19 = arith.constant 0 : i32
      %16 = tpu.memref_slice %arg2[%c0_i32_18, %c0_i32_19] : memref<11x128xf32, #tpu.memory_space<any>> -> memref<1x128xf32, #tpu.memory_space<any>>
      %c0_i32_20 = arith.constant 0 : i32
      %c0_i32_21 = arith.constant 0 : i32
      %17 = tpu.memref_slice %arg3[%c0_i32_20, %c0_i32_21] : memref<8x128xf32, #tpu.memory_space<vmem>> -> memref<1x128xf32, #tpu.memory_space<vmem>>
      %18 = tpu.memref_slice %arg4[%15] : memref<8x!tpu.dma_semaphore, #tpu.memory_space<semaphore_mem>> -> memref<1x!tpu.dma_semaphore, #tpu.memory_space<semaphore_mem>>
      %19 = tpu.memref_squeeze %18 : memref<1x!tpu.dma_semaphore, #tpu.memory_space<semaphore_mem>> -> memref<!tpu.dma_semaphore, #tpu.memory_space<semaphore_mem>>
      tpu.wait_dma2 semaphore(%19 : memref<!tpu.dma_semaphore, #tpu.memory_space<semaphore_mem>>) src(%16 : memref<1x128xf32, #tpu.memory_space<any>>) dst(%17 : memref<1x128xf32, #tpu.memory_space<vmem>>)
      %20 = arith.addi %0, %5 : i32
      %21 = arith.index_cast %20 : i32 to index
      %22 = memref.load %arg1[%21] : memref<8xi32, #tpu.memory_space<smem>>
      %c8_i32_22 = arith.constant 8 : i32
      %c0_i32_23 = arith.constant 0 : i32
      %23 = arith.cmpi eq, %c8_i32_22, %c0_i32_23 : i32
      %c1_i32_24 = arith.constant 1 : i32
      %24 = arith.select %23, %c1_i32_24, %c8_i32_22 : i32
      %25 = arith.remsi %5, %24 : i32
      %c0_i32_25 = arith.constant 0 : i32
      %26 = arith.cmpi ne, %25, %c0_i32_25 : i32
      %c0_i32_26 = arith.constant 0 : i32
      %27 = arith.cmpi slt, %25, %c0_i32_26 : i32
      %c0_i32_27 = arith.constant 0 : i32
      %28 = arith.cmpi slt, %24, %c0_i32_27 : i32
      %29 = arith.xori %27, %28 : i1
      %30 = arith.andi %29, %26 : i1
      %31 = arith.addi %25, %24 : i32
      %32 = arith.select %30, %31, %25 : i32
      %c0_i32_28 = arith.constant 0 : i32
      %33 = tpu.memref_slice %arg2[%22, %c0_i32_28] : memref<11x128xf32, #tpu.memory_space<any>> -> memref<1x128xf32, #tpu.memory_space<any>>
      %c0_i32_29 = arith.constant 0 : i32
      %34 = tpu.memref_slice %arg3[%5, %c0_i32_29] : memref<8x128xf32, #tpu.memory_space<vmem>> -> memref<1x128xf32, #tpu.memory_space<vmem>>
      %35 = tpu.memref_slice %arg4[%32] : memref<8x!tpu.dma_semaphore, #tpu.memory_space<semaphore_mem>> -> memref<1x!tpu.dma_semaphore, #tpu.memory_space<semaphore_mem>>
      %36 = tpu.memref_squeeze %35 : memref<1x!tpu.dma_semaphore, #tpu.memory_space<semaphore_mem>> -> memref<!tpu.dma_semaphore, #tpu.memory_space<semaphore_mem>>
      tpu.enqueue_dma source(%33 : memref<1x128xf32, #tpu.memory_space<any>>) target(%34 : memref<1x128xf32, #tpu.memory_space<vmem>>) target_semaphore(%36 : memref<!tpu.dma_semaphore, #tpu.memory_space<semaphore_mem>>)
    }
    %c0_i32_5 = arith.constant 0 : i32
    %c0_i32_6 = arith.constant 0 : i32
    %c8_i32_7 = arith.constant 8 : i32
    %3 = arith.addi %c0_i32_6, %c8_i32_7 : i32
    %c1_i32_8 = arith.constant 1 : i32
    scf.for %arg5 = %c0_i32_6 to %3 step %c1_i32_8  : i32 {
      %c1_i32_10 = arith.constant 1 : i32
      %4 = arith.muli %arg5, %c1_i32_10 : i32
      %c0_i32_11 = arith.constant 0 : i32
      %5 = arith.addi %c0_i32_11, %4 : i32
      %c8_i32_12 = arith.constant 8 : i32
      %c0_i32_13 = arith.constant 0 : i32
      %6 = arith.cmpi eq, %c8_i32_12, %c0_i32_13 : i32
      %c1_i32_14 = arith.constant 1 : i32
      %7 = arith.select %6, %c1_i32_14, %c8_i32_12 : i32
      %8 = arith.remsi %5, %7 : i32
      %c0_i32_15 = arith.constant 0 : i32
      %9 = arith.cmpi ne, %8, %c0_i32_15 : i32
      %c0_i32_16 = arith.constant 0 : i32
      %10 = arith.cmpi slt, %8, %c0_i32_16 : i32
      %c0_i32_17 = arith.constant 0 : i32
      %11 = arith.cmpi slt, %7, %c0_i32_17 : i32
      %12 = arith.xori %10, %11 : i1
      %13 = arith.andi %12, %9 : i1
      %14 = arith.addi %8, %7 : i32
      %15 = arith.select %13, %14, %8 : i32
      %c0_i32_18 = arith.constant 0 : i32
      %c0_i32_19 = arith.constant 0 : i32
      %16 = tpu.memref_slice %arg2[%c0_i32_18, %c0_i32_19] : memref<11x128xf32, #tpu.memory_space<any>> -> memref<1x128xf32, #tpu.memory_space<any>>
      %c0_i32_20 = arith.constant 0 : i32
      %c0_i32_21 = arith.constant 0 : i32
      %17 = tpu.memref_slice %arg3[%c0_i32_20, %c0_i32_21] : memref<8x128xf32, #tpu.memory_space<vmem>> -> memref<1x128xf32, #tpu.memory_space<vmem>>
      %18 = tpu.memref_slice %arg4[%15] : memref<8x!tpu.dma_semaphore, #tpu.memory_space<semaphore_mem>> -> memref<1x!tpu.dma_semaphore, #tpu.memory_space<semaphore_mem>>
      %19 = tpu.memref_squeeze %18 : memref<1x!tpu.dma_semaphore, #tpu.memory_space<semaphore_mem>> -> memref<!tpu.dma_semaphore, #tpu.memory_space<semaphore_mem>>
      tpu.wait_dma2 semaphore(%19 : memref<!tpu.dma_semaphore, #tpu.memory_space<semaphore_mem>>) src(%16 : memref<1x128xf32, #tpu.memory_space<any>>) dst(%17 : memref<1x128xf32, #tpu.memory_space<vmem>>)
    }
    %c8_i32_9 = arith.constant 8 : i32
    return
  }
  func.func @transform_1(%arg0: i32, %arg1: memref<8xi32, #tpu.memory_space<smem>>) -> (i32, i32) {
    %c0_i32 = arith.constant 0 : i32
    %c0_i32_0 = arith.constant 0 : i32
    return %arg0, %c0_i32 : i32, i32
  }
}

</mosaic_0001>

<bundles_post_ra>
// kernel: label_embedder_forward.1
= control target key start
LH: loop header
LB: loop body
LE: loop exit
PB: predicated region body
PF: predicated region fallthrough
CT: control target
= control target key end

     0   :  { %s342_s0 = inlined_call_operand.hbm [shape: s32[8], index: 0, kind: input, shape index: {}]   ;;  %s343_s1 = inlined_call_operand.hbm [shape: f32[11,128], index: 1, kind: input, shape index: {}]   ;;  %s344_s2 = inlined_call_operand.hbm [shape: f32[8,128], index: 2, kind: output, shape index: {}]  }
   0x1   :  { %s187_s11 = scalar_lea.hbm %s342_s0, 16 }
   0x2   :  { %p188_p0 = scmp.ne.s32.totalorder %s342_s0, %s187_s11  ;;  %p191_p1 = scmp.lt.u32.totalorder %s187_s11, %s342_s0 }
   0x4   :  { %p193_p2 = pnand %p191_p1, %p188_p0 }
   0x6   :  { %196 = shalt.err (!%p193_p2)  }
   0x7   :  { %s265_s16 = smov [#allocation4]  }
   0x8   :  { %8 = dma.hbm_to_smem %s342_s0, 16, %s265_s16, [#allocation3] }
   0x9   :  { %251 = dma.done.wait [#allocation3], 16 }
   0xa   :  { %252 = vsyncadd [#allocation3], 4294967280 }
   0xb   :  { %10 = sfence }
   0xc   :  { %11 = vsyncpa [#allocation6], 0  ;;  %s294_s19 = smov 0  }
   0xd LB: > { %s20_s20 = sld [smem:[#allocation4 + %s259_s19]]  ;;  %p21_p3 = scmp.lt.s32.totalorder %s259_s19, 0  ;;  %s259_s19 = sphi %s294_s19, %s18_s19  }
   0xe   : > { %s22_s21 = ssub.s32 0, %s259_s19  ;;  %s35_s24 = scalar_lea.vmem [#allocation5], %s259_s19 }
   0xf   : > { %s154_s0 = smin.u32 %s259_s19, %s22_s21  ;;  %s44_s25 = sshll.u32 %s35_s24, 4  ;;  %s45_s25 = int_to_ptr.vmem [resolvable:$true] %s44_s25 }
  0x10   : > { %s24_s22 = sand.u32 7, %s154_s0   ;;  %s199_s7 = scalar_lea.hbm %s343_s1, 256 }
  0x11   : > { %s25_s23 = ssub.s32 0, %s24_s22 }
  0x12   : > { %s346_s23 = smov (!%p21_p3, %s25_s23), %s24_s22 }
  0x13   : > { %s157_s26 = sshll.u32 %s20_s20, 4  ;;  %p156_p4 = scmp.lt.s32.totalorder %s346_s23, 0 }
  0x14   : > { %s31_s27 = sadd.s32 8, %s346_s23  ;;  %s34_s30 = scalar_lea.hbm %s343_s1, %s157_s26 }
  0x15   : > { %s348_s27 = smov (!%p156_p4, %s31_s27), %s346_s23  ;;  %s197_s4 = scalar_lea.hbm %s34_s30, 16 }
  0x16   : > { %s36_s3 = scalar_lea.sflag [#allocation2], %s348_s27  ;;  %p198_p5 = scmp.ne.s32.totalorder %s34_s30, %s197_s4 }
  0x17   : > { %p200_p6 = scmp.lt.u32.totalorder %s34_s30, %s343_s1  ;;  %p201_p7 = scmp.lt.u32.totalorder %s199_s7, %s197_s4 }
  0x18   : > { %p203_p9 = scmp.lt.u32.totalorder %s197_s4, %s34_s30 }
  0x19   : > { %p202_p8 = por %p201_p7, %p200_p6 }
  0x1b   : > { %p204_p10 = por %p203_p9, %p202_p8 }
  0x1d   : > { %p205_p11 = pnand %p204_p10, %p198_p5 }
  0x1f   : > { %208 = shalt.err (!%p205_p11)  }
  0x20   : > { %s209_s10 = scalar_lea.vmem %s45_s25, 16  ;;  %s266_s11 = smov [#allocation5]  }
  0x21   : > { %p210_p12 = scmp.ne.s32.totalorder %s45_s25, %s209_s10  ;;  %s211_s12 = sshll.u32 %s266_s11, 4  ;;  %s313_s12 = int_to_ptr.vmem [resolvable:$false] %s211_s12 }
  0x22   : > { %s316_s13 = scalar_lea.vmem %s313_s12, 128  ;;  %p214_p13 = scmp.lt.s32.totalorder %s45_s25, %s313_s12 }
  0x23   : > { %p215_p0 = scmp.lt.s32.totalorder %s316_s13, %s209_s10 }
  0x25   : > { %p216_p1 = por %p215_p0, %p214_p13 }
  0x27   : > { %p217_p2 = pnand %p216_p1, %p210_p12 }
  0x29   : > { %220 = shalt.err (!%p217_p2)  }
  0x2a   : > { %47 = dma.hbm_to_vmem [thread:$0]  %s34_s30, 16, %s45_s25, %s36_s3 }
  0x2b   : > { %s18_s19 = sadd.s32 1, %s259_s19  }
  0x2c   : > { %p15_p3 = scmp.ge.s32.totalorder %s18_s19, 8  }
  0x2d   :  { %s261_s14 = smov (%p15_p3), 0  }
  0x2e   :  { %17 = sbr.rel (!%p15_p3) target bundleno = 13 (0xd), region = 49 }
  0x35 LB: > { %p54_p4 = scmp.lt.s32.totalorder %s263_s14, 0  ;;  %s55_s15 = ssub.s32 0, %s263_s14  ;;  %s263_s14 = sphi %s261_s14, %s53_s14  }
  0x36   : > { %s158_s16 = smin.u32 %s263_s14, %s55_s15 }
  0x37   : > { %s57_s17 = sand.u32 7, %s158_s16  }
  0x38   : > { %s58_s18 = ssub.s32 0, %s57_s17 }
  0x39   : > { %s350_s18 = smov (!%p54_p4, %s58_s18), %s57_s17 }
  0x3a   : > { %p160_p5 = scmp.lt.s32.totalorder %s350_s18, 0  ;;  %s64_s20 = sadd.s32 8, %s350_s18 }
  0x3c   : > { %s352_s20 = smov (!%p160_p5, %s64_s20), %s350_s18 }
  0x3d   : > { %s66_s21 = scalar_lea.sflag [#allocation2], %s352_s20 }
  0x3e   : > { %253 = dma.done.wait %s66_s21, 16 }
  0x3f   : > { %254 = vsyncadd %s66_s21, 4294967280  ;;  %s53_s14 = sadd.s32 1, %s263_s14  }
  0x40   : > { %p50_p6 = scmp.ge.s32.totalorder %s53_s14, 8  }
  0x41   :  { %p222_p7 = scmp.ne.s32.totalorder (%p50_p6), %s313_s12, %s316_s13  ;;  %p226_p8 = scmp.lt.s32.totalorder (%p50_p6), %s313_s12, %s313_s12 }
  0x42   :  { %52 = sbr.rel (!%p50_p6) target bundleno = 53 (0x35), region = 60  ;;  %p227_p9 = scmp.lt.s32.totalorder (%p50_p6), %s316_s13, %s316_s13 }
  0x44   :  { %p228_p10 = por (%p50_p6), %p227_p9, %p226_p8 }
  0x46   :  { %p229_p11 = pnand (%p50_p6), %p228_p10, %p222_p7 }
  0x49   :  { %232 = shalt.err (!%p229_p11)
}
  0x4a   :  { %s233_s0 = scalar_lea.hbm %s344_s2, 128 }
  0x4b   :  { %p234_p12 = scmp.ne.s32.totalorder %s344_s2, %s233_s0  ;;  %p237_p13 = scmp.lt.u32.totalorder %s233_s0, %s344_s2 }
  0x4d   :  { %p239_p0 = pnand %p237_p13, %p234_p12 }
  0x4f   :  { %242 = shalt.err (!%p239_p0)
}
  0x50   :  { %79 = dma.vmem_to_hbm [thread:$0]  %s313_s12, 128, %s344_s2, [#allocation6]  }
  0x51   :  { %255 = dma.done.wait [#allocation6], 128  }
  0x52   :  { %256 = vsyncadd [#allocation6], 4294967168 }
  0x53   :  { %83 = vsyncpa [#allocation6], 1 }
  0x54   :  { %84 = vsyncmov [#allocation2] }
  0x57   :  { %s85_s28 = vpop.sfrf %84 }
  0x58   :  { %p161_p1 = scmp.ne.s32.totalorder %s85_s28, 0 }
  0x5a   :  { %89 = shalt.err (%p161_p1)  }
  0x5b   :  { %91 = vsyncmov [#allocation2 + $0x1] }
  0x5e   :  { %s92_s29 = vpop.sfrf %91 }
  0x5f   :  { %p162_p2 = scmp.ne.s32.totalorder %s92_s29, 0 }
  0x61   :  { %96 = shalt.err (%p162_p2)  }
  0x62   :  { %98 = vsyncmov [#allocation2 + $0x2] }
  0x65   :  { %s99_s30 = vpop.sfrf %98 }
  0x66   :  { %p163_p3 = scmp.ne.s32.totalorder %s99_s30, 0 }
  0x68   :  { %103 = shalt.err (%p163_p3)  }
  0x69   :  { %105 = vsyncmov [#allocation2 + $0x3] }
  0x6c   :  { %s106_s3 = vpop.sfrf %105 }
  0x6d   :  { %p164_p4 = scmp.ne.s32.totalorder %s106_s3, 0 }
  0x6f   :  { %110 = shalt.err (%p164_p4)  }
  0x70   :  { %112 = vsyncmov [#allocation2 + $0x4] }
  0x73   :  { %s113_s2 = vpop.sfrf %112 }
  0x74   :  { %p165_p5 = scmp.ne.s32.totalorder %s113_s2, 0 }
  0x76   :  { %117 = shalt.err (%p165_p5)  }
  0x77   :  { %119 = vsyncmov [#allocation2 + $0x5] }
  0x7a   :  { %s120_s4 = vpop.sfrf %119 }
  0x7b   :  { %p166_p6 = scmp.ne.s32.totalorder %s120_s4, 0 }
  0x7d   :  { %124 = shalt.err (%p166_p6)  }
  0x7e   :  { %126 = vsyncmov [#allocation2 + $0x6] }
  0x81   :  { %s127_s5 = vpop.sfrf %126 }
  0x82   :  { %p167_p7 = scmp.ne.s32.totalorder %s127_s5, 0 }
  0x84   :  { %131 = shalt.err (%p167_p7)  }
  0x85   :  { %133 = vsyncmov [#allocation2 + $0x7] }
  0x88   :  { %s134_s6 = vpop.sfrf %133 }
  0x89   :  { %p168_p8 = scmp.ne.s32.totalorder %s134_s6, 0 }
  0x8b   :  { %138 = shalt.err (%p168_p8)  }

</bundles_post_ra>
